<compile_context>
chip_gen: v7x
topology: tpu7x:2x2x1
jax: 0.10.0
libtpu: 0.0.40
codegen_flags: <defaults>
</compile_context>

<pallas_src>
import jax
import jax.numpy as jnp
from jax.experimental import pallas as pl

CLAMP_MIN = 0.2
CLAMP_MAX = 0.4

IC, OC = 16, 16
KH = KW = 20
STRIDE = 20


def _conv_clamp_kernel(w_ref, p_ref, b_ref, o_ref):
    # o[oc, m] = sum_K w[oc, K] * p[m, K]   ==   A @ B^T  (MXU-native trans_b),
    # so neither operand needed a host-side transpose.
    acc = jax.lax.dot_general(
        w_ref[...],                       # (OC, K)  natural weight flatten
        p_ref[...],                       # (M,  K)  patches
        dimension_numbers=(((1,), (1,)), ((), ())),
        preferred_element_type=jnp.float32,
    )                                     # -> (OC, M)
    acc = acc + b_ref[...]                # bias (OC, 1) broadcast over patches
    acc = jnp.maximum(acc, CLAMP_MIN)     # torch.clamp_min
    acc = jnp.minimum(acc, CLAMP_MAX)     # torch.clamp_max
    o_ref[...] = acc.astype(o_ref.dtype)


@jax.jit
def conv_clamp(x, weight, bias):
    """x: (1, IC, H, W) f32; weight: (OC, IC, KH, KW) f32; bias: (OC,) f32."""
    n, ic, h, w = x.shape
    assert n == 1 and ic == IC
    assert h % STRIDE == 0 and w % STRIDE == 0
    oh, ow = h // STRIDE, w // STRIDE
    M = oh * ow                # 25
    K = IC * KH * KW           # 6400

    # --- glue: extract non-overlapping patches (single XLA transpose; see TODO) ---
    # (n, ic, oh, kh, ow, kw) -> (n, oh, ow, ic, kh, kw) -> (oh*ow, ic*kh*kw)
    patches = x.reshape(n, IC, oh, KH, ow, KW).transpose(0, 2, 4, 1, 3, 5)
    patches = patches.reshape(M, K)

    w2 = weight.reshape(OC, K)            # free reshape — NO transpose
    b2 = bias.reshape(OC, 1)              # broadcast over patch columns

    out_mat = pl.pallas_call(
        _conv_clamp_kernel,
        out_shape=jax.ShapeDtypeStruct((OC, M), jnp.float32),
        in_specs=[
            pl.BlockSpec((OC, K), lambda: (0, 0)),
            pl.BlockSpec((M, K), lambda: (0, 0)),
            pl.BlockSpec((OC, 1), lambda: (0, 0)),
        ],
        out_specs=pl.BlockSpec((OC, M), lambda: (0, 0)),
        # No grid / no compiler_params: single block, default VMEM limit
        # (v7x-safe); problem is DMA + launch-overhead bound.
    )(w2, patches, b2)

    # (OC, oh*ow) -> (1, OC, oh, ow): pure reshape, no transpose, no data move.
    # NOTE: if this op were ever batched over many images, fold the batch into
    # the patch rows (M) rather than looping pallas_call (review item 6).
    return out_mat.reshape(n, OC, oh, ow)


def _reference(x, weight, bias):
    out = jax.lax.conv_general_dilated(
        x, weight,
        window_strides=(STRIDE, STRIDE),
        padding="VALID",
        dimension_numbers=("NCHW", "OIHW", "NCHW"),
    )
    out = out + bias.reshape(1, OC, 1, 1)
    return jnp.minimum(jnp.maximum(out, CLAMP_MIN), CLAMP_MAX)


if __name__ == "__main__":
    key = jax.random.PRNGKey(0)
    kx, kw, kb = jax.random.split(key, 3)

    # Deterministic synthetic parameters (same shapes as torch.nn.Conv2d init).
    fan_in = IC * KH * KW
    bound = 1.0 / (fan_in ** 0.5)
    weight = jax.random.uniform(kw, (OC, IC, KH, KW), jnp.float32, -bound, bound)
    bias = jax.random.uniform(kb, (OC,), jnp.float32, -bound, bound)

    # Same input shape as the PyTorch script: (1, 16, 100, 100).
    x = jax.random.normal(kx, (1, IC, 100, 100), jnp.float32)

    out = conv_clamp(x, weight, bias)
    jax.block_until_ready(out)

    ref = _reference(x, weight, bias)
    assert out.shape == (1, 16, 5, 5), out.shape
    assert jnp.allclose(out, ref, atol=1e-4, rtol=1e-4), float(jnp.max(jnp.abs(out - ref)))

    print("KERNEL_OK")
</pallas_src>

<mosaic_0001>
module attributes {stable_mosaic.version = 11 : i64} {
  func.func @_conv_clamp_kernel(%arg0: memref<16x6400xf32, #tpu.memory_space<vmem>>, %arg1: memref<25x6400xf32, #tpu.memory_space<vmem>>, %arg2: memref<16x1xf32, #tpu.memory_space<vmem>>, %arg3: memref<16x25xf32, #tpu.memory_space<vmem>>) attributes {dimension_semantics = [], scalar_prefetch = 0 : i64, scratch_operands = 0 : i64, tpu.core_type = #tpu.core_type<tc>} {
    %c0 = arith.constant 0 : index
    %c0_0 = arith.constant 0 : index
    %0 = vector.load %arg0[%c0, %c0_0] : memref<16x6400xf32, #tpu.memory_space<vmem>>, vector<16x6400xf32>
    %c0_1 = arith.constant 0 : index
    %c0_2 = arith.constant 0 : index
    %1 = vector.load %arg1[%c0_1, %c0_2] : memref<25x6400xf32, #tpu.memory_space<vmem>>, vector<25x6400xf32>
    %cst = arith.constant dense<0.000000e+00> : vector<16x25xf32>
    %2 = tpu.matmul %0, %1, %cst {dimension_numbers = #tpu.dot_dimension_numbers<[1], [1], [0], [0], [0, 0, 1, 0], [], []>} : vector<16x6400xf32>, vector<25x6400xf32>, vector<16x25xf32> -> vector<16x25xf32>
    %c0_3 = arith.constant 0 : index
    %c0_4 = arith.constant 0 : index
    %3 = vector.load %arg2[%c0_3, %c0_4] : memref<16x1xf32, #tpu.memory_space<vmem>>, vector<16x1xf32>
    %4 = vector.broadcast %3 : vector<16x1xf32> to vector<16x25xf32>
    %5 = arith.addf %2, %4 : vector<16x25xf32>
    %cst_5 = arith.constant 2.000000e-01 : f32
    %6 = vector.broadcast %cst_5 : f32 to vector<16x25xf32>
    %7 = arith.maximumf %5, %6 : vector<16x25xf32>
    %cst_6 = arith.constant 4.000000e-01 : f32
    %8 = vector.broadcast %cst_6 : f32 to vector<16x25xf32>
    %9 = arith.minimumf %7, %8 : vector<16x25xf32>
    %c0_7 = arith.constant 0 : index
    %c0_8 = arith.constant 0 : index
    %10 = vector.load %arg3[%c0_7, %c0_8] : memref<16x25xf32, #tpu.memory_space<vmem>>, vector<16x25xf32>
    tpu.vector_store %arg3[%c0_7, %c0_8], %9 {strides = array<i32>} : memref<16x25xf32, #tpu.memory_space<vmem>>, vector<16x25xf32>,
    return
  }
}

</mosaic_0001>

<bundles_post_ra>
// kernel: conv_clamp.1
= control target key start
LH: loop header
LB: loop body
LE: loop exit
PB: predicated region body
PF: predicated region fallthrough
CT: control target
= control target key end

     0   :  { %vm2205_vm0 = vcmask 203776   ;;  %s3446_s1 = inlined_call_operand.vmem [shape: f32[25,6400], index: 1, kind: input, shape index: {}]   ;;  %s3447_s0 = inlined_call_operand.vmem [shape: f32[16,6400], index: 0, kind: input, shape index: {}]   ;;  %s3448_s2 = inlined_call_operand.vmem [shape: f32[16,1], index: 2, kind: input, shape index: {}]   ;;  %s3449_s3 = inlined_call_operand.vmem [shape: f32[16,25], index: 3, kind: output, shape index: {}]  }
   0x1   :  { %v115_v0 = vld [vmem:[%s3446_s1 + $0x8] sm:$0xff]  ;;  %v165_v1 = vld [vmem:[%s3446_s1 + $0x198] sm:$0xff]  ;;  %v114_v5 = vld [vmem:[%s3446_s1] sm:$0xff] }
   0x2   :  { %v139_v2 = vld [vmem:[%s3446_s1 + $0xc8] sm:$0xff]  ;;  %v2212_v3 = vpack.c.bf16 %v165_v1, %v115_v0  ;;  %v189_v4 = vld [vmem:[%s3446_s1 + $0x258] sm:$0xff]  ;;  %v164_v6 = vld [vmem:[%s3446_s1 + $0x190] sm:$0xff] }
   0x3   :  { %v2308_v7 = vpack.c.bf16 %v189_v4, %v139_v2  ;;  %v2214_v8 = vpack.c.bf16 %v164_v6, %v114_v5  ;;  %v138_v9 = vld [vmem:[%s3446_s1 + $0xc0] sm:$0xff]  ;;  %v188_v10 = vld [vmem:[%s3446_s1 + $0x250] sm:$0xff]  ;;  %v215_v11 = vld [vmem:[%s3446_s1 + $0x328] sm:$0xff] }
   0x4   :  { %2213 = vmatprep.subr.bf16.mxu1 %v2212_v3  ;;  %v2310_v12 = vpack.c.bf16 %v188_v10, %v138_v9  ;;  %v265_v13 = vld [vmem:[%s3446_s1 + $0x4b8] sm:$0x1]  ;;  %v239_v14 = vld [vmem:[%s3446_s1 + $0x3e8] sm:$0xff]  ;;  %v214_v18 = vld [vmem:[%s3446_s1 + $0x320] sm:$0xff] }
   0x5   :  { %v289_v15 = vld [vmem:[%s3446_s1 + $0x578] sm:$0x1]  ;;  %2309 = vmatprep.subr.bf16.mxu0 %v2308_v7  ;;  %2215 = vmatpush1.bf16.xpose.msra.mxu1 %v2214_v8  ;;  %v2216_v16 = vpack.c.bf16 %v265_v13, %v215_v11  ;;  %v264_v19 = vld [vmem:[%s3446_s1 + $0x4b0] sm:$0x1]  ;;  %v238_v20 = vld [vmem:[%s3446_s1 + $0x3e0] sm:$0xff] }
   0x6   :  { %v2312_v17 = vpack.c.bf16 %v289_v15, %v239_v14  ;;  %2311 = vmatpush1.bf16.xpose.msra.mxu0 %v2310_v12  ;;  %v288_v21 = vld [vmem:[%s3446_s1 + $0x570] sm:$0x1]  ;;  %v15_v22 = vld [vmem:[%s3447_s0 + $0x8] sm:$0xff]  ;;  %v117_v23 = vld [vmem:[%s3446_s1 + $0x18] sm:$0xff]  ;;  %v2218_v28 = vpack.c.bf16 %v264_v19, %v214_v18 }
   0x7   :  { %2217 = vmatprep.subr.bf16.mxu1 %v2216_v16  ;;  %v167_v24 = vld [vmem:[%s3446_s1 + $0x1a8] sm:$0xff]  ;;  %390 = vmatprep.mubr.f32.mxu1 %v15_v22  ;;  %v141_v26 = vld [vmem:[%s3446_s1 + $0xd8] sm:$0xff]  ;;  %v2314_v29 = vpack.c.bf16 %v288_v21, %v238_v20  ;;  %v116_v32 = vld [vmem:[%s3446_s1 + $0x10] sm:$0xff] }
   0x8   :  { %2313 = vmatprep.subr.bf16.mxu0 %v2312_v17  ;;  %v39_v25 = vld [vmem:[%s3447_s0 + $0xc8] sm:$0xff]  ;;  %v2220_v30 = vpack.c.bf16 %v167_v24, %v117_v23  ;;  %v166_v33 = vld [vmem:[%s3446_s1 + $0x1a0] sm:$0xff]  ;;  %v140_v34 = vld [vmem:[%s3446_s1 + $0xd0] sm:$0xff] }
   0x9   :  { %1290 = vmatprep.mubr.f32.mxu0 %v39_v25  ;;  %v191_v27 = vld [vmem:[%s3446_s1 + $0x268] sm:$0xff]  ;;  %v190_v35 = vld [vmem:[%s3446_s1 + $0x260] sm:$0xff]  ;;  %v217_v36 = vld [vmem:[%s3446_s1 + $0x338] sm:$0xff]  ;;  %v2222_v41 = vpack.c.bf16 %v166_v33, %v116_v32 }
   0xa   :  { %v2316_v31 = vpack.c.bf16 %v191_v27, %v141_v26  ;;  %v267_v37 = vld [vmem:[%s3446_s1 + $0x4c8] sm:$0x1]  ;;  %v241_v38 = vld [vmem:[%s3446_s1 + $0x3f8] sm:$0xff]  ;;  %v14_v40 = vld [vmem:[%s3447_s0] sm:$0xff]  ;;  %v2318_v43 = vpack.c.bf16 %v190_v35, %v140_v34 }
   0xb   :  { %v291_v39 = vld [vmem:[%s3446_s1 + $0x588] sm:$0x1]  ;;  %v38_v42 = vld [vmem:[%s3447_s0 + $0xc0] sm:$0xff]  ;;  %v2224_v44 = vpack.c.bf16 %v267_v37, %v217_v36  ;;  %v216_v46 = vld [vmem:[%s3446_s1 + $0x330] sm:$0xff] }
   0xc   :  { %v2320_v45 = vpack.c.bf16 %v291_v39, %v241_v38  ;;  %v266_v47 = vld [vmem:[%s3446_s1 + $0x4c0] sm:$0x1]  ;;  %v65_v48 = vld [vmem:[%s3447_s0 + $0x198] sm:$0xff]  ;;  %v240_v49 = vld [vmem:[%s3446_s1 + $0x3f0] sm:$0xff] }
   0xd   :  { %2219 = vmatpush1.bf16.xpose.msra.mxu1 %v2218_v28  ;;  %v89_v50 = vld [vmem:[%s3447_s0 + $0x258] sm:$0xff]  ;;  %v64_v51 = vld [vmem:[%s3447_s0 + $0x190] sm:$0xff]  ;;  %v290_v52 = vld [vmem:[%s3446_s1 + $0x580] sm:$0x1]  ;;  %v2226_v60 = vpack.c.bf16 %v266_v47, %v216_v46 }
   0xe   :  { %2315 = vmatpush1.bf16.xpose.msra.mxu0 %v2314_v29  ;;  %2221 = vmatprep.subr.bf16.mxu1 %v2220_v30  ;;  %v88_v53 = vld [vmem:[%s3447_s0 + $0x250] sm:$0xff]  ;;  %v17_v54 = vld [vmem:[%s3447_s0 + $0x18] sm:$0xff]  ;;  %v119_v55 = vld [vmem:[%s3446_s1 + $0x28] sm:$0xff]  ;;  %v2322_v61 = vpack.c.bf16 %v290_v52, %v240_v49 }
   0xf   :  { %2317 = vmatprep.subr.bf16.mxu0 %v2316_v31  ;;  %v169_v56 = vld [vmem:[%s3446_s1 + $0x1b8] sm:$0xff]  ;;  %v143_v58 = vld [vmem:[%s3446_s1 + $0xe8] sm:$0xff]  ;;  %v118_v0 = vld [vmem:[%s3446_s1 + $0x20] sm:$0xff] }
  0x10   :  { %v41_v57 = vld [vmem:[%s3447_s0 + $0xd8] sm:$0xff]  ;;  %v2228_v62 = vpack.c.bf16 %v169_v56, %v119_v55  ;;  %v168_v1 = vld [vmem:[%s3446_s1 + $0x1b0] sm:$0xff]  ;;  %v142_v2 = vld [vmem:[%s3446_s1 + $0xe0] sm:$0xff] }
  0x11   :  { %v193_v59 = vld [vmem:[%s3446_s1 + $0x278] sm:$0xff]  ;;  %v192_v3 = vld [vmem:[%s3446_s1 + $0x270] sm:$0xff]  ;;  %v219_v4 = vld [vmem:[%s3446_s1 + $0x348] sm:$0xff]  ;;  %v2230_v9 = vpack.c.bf16 %v168_v1, %v118_v0 }
  0x12   :  { %v2324_v63 = vpack.c.bf16 %v193_v59, %v143_v58  ;;  %v269_v5 = vld [vmem:[%s3446_s1 + $0x4d8] sm:$0x1]  ;;  %v243_v6 = vld [vmem:[%s3446_s1 + $0x408] sm:$0xff]  ;;  %v16_v8 = vld [vmem:[%s3447_s0 + $0x10] sm:$0xff]  ;;  %v2326_v11 = vpack.c.bf16 %v192_v3, %v142_v2 }
  0x13   :  { %v293_v7 = vld [vmem:[%s3446_s1 + $0x598] sm:$0x1]  ;;  %v40_v10 = vld [vmem:[%s3447_s0 + $0xd0] sm:$0xff]  ;;  %v2232_v12 = vpack.c.bf16 %v269_v5, %v219_v4  ;;  %v218_v14 = vld [vmem:[%s3446_s1 + $0x340] sm:$0xff] }
  0x14   :  { %391 = vmatmul.mubr.f32.vlgmr.msra.gmra.mrb[0].mxu1 %v14_v40  ;;  %v2328_v13 = vpack.c.bf16 %v293_v7, %v243_v6  ;;  %v268_v15 = vld [vmem:[%s3446_s1 + $0x4d0] sm:$0x1]  ;;  %v67_v16 = vld [vmem:[%s3447_s0 + $0x1a8] sm:$0xff]  ;;  %v242_v17 = vld [vmem:[%s3446_s1 + $0x400] sm:$0xff] }
  0x15   :  { %2223 = vmatpush1.bf16.xpose.msra.mxu1 %v2222_v41  ;;  %1291 = vmatmul.mubr.f32.vlgmr.msra.gmra.mrb[0].mxu0 %v38_v42  ;;  %v91_v18 = vld [vmem:[%s3447_s0 + $0x268] sm:$0xff]  ;;  %v66_v19 = vld [vmem:[%s3447_s0 + $0x1a0] sm:$0xff]  ;;  %v292_v20 = vld [vmem:[%s3446_s1 + $0x590] sm:$0x1]  ;;  %v2234_v28 = vpack.c.bf16 %v268_v15, %v218_v14 }
  0x16   :  { %2319 = vmatpush1.bf16.xpose.msra.mxu0 %v2318_v43  ;;  %2225 = vmatprep.subr.bf16.mxu1 %v2224_v44  ;;  %v90_v21 = vld [vmem:[%s3447_s0 + $0x260] sm:$0xff]  ;;  %v19_v22 = vld [vmem:[%s3447_s0 + $0x28] sm:$0xff]  ;;  %v121_v23 = vld [vmem:[%s3446_s1 + $0x38] sm:$0xff]  ;;  %v2330_v29 = vpack.c.bf16 %v292_v20, %v242_v17 }
  0x17   :  { %2321 = vmatprep.subr.bf16.mxu0 %v2320_v45  ;;  %395 = vmatprep.mubr.f32.mxu1 %v65_v48  ;;  %v171_v24 = vld [vmem:[%s3446_s1 + $0x1c8] sm:$0xff]  ;;  %v145_v26 = vld [vmem:[%s3446_s1 + $0xf8] sm:$0xff]  ;;  %v120_v32 = vld [vmem:[%s3446_s1 + $0x30] sm:$0xff] }
  0x18   :  { %1295 = vmatprep.mubr.f32.mxu0 %v89_v50  ;;  %396 = vmatmul.mubr.f32.gmra.mrb[2].mxu1 %v64_v51  ;;  %v43_v25 = vld [vmem:[%s3447_s0 + $0xe8] sm:$0xff]  ;;  %v2236_v30 = vpack.c.bf16 %v171_v24, %v121_v23  ;;  %v170_v33 = vld [vmem:[%s3446_s1 + $0x1c0] sm:$0xff]  ;;  %v144_v34 = vld [vmem:[%s3446_s1 + $0xf0] sm:$0xff] }
  0x19   :  { %1296 = vmatmul.mubr.f32.gmra.mrb[2].mxu0 %v88_v53  ;;  %465 = vmatprep.mubr.f32.mxu1 %v17_v54  ;;  %v195_v27 = vld [vmem:[%s3446_s1 + $0x288] sm:$0xff]  ;;  %v194_v35 = vld [vmem:[%s3446_s1 + $0x280] sm:$0xff]  ;;  %v221_v36 = vld [vmem:[%s3446_s1 + $0x358] sm:$0xff]  ;;  %v2238_v41 = vpack.c.bf16 %v170_v33, %v120_v32 }
  0x1a   :  { %1365 = vmatprep.mubr.f32.mxu0 %v41_v57  ;;  %v2332_v31 = vpack.c.bf16 %v195_v27, %v145_v26  ;;  %v271_v37 = vld [vmem:[%s3446_s1 + $0x4e8] sm:$0x1]  ;;  %v245_v38 = vld [vmem:[%s3446_s1 + $0x418] sm:$0xff]  ;;  %v18_v40 = vld [vmem:[%s3447_s0 + $0x20] sm:$0xff]  ;;  %v2334_v43 = vpack.c.bf16 %v194_v35, %v144_v34 }
  0x1b   :  { %v295_v39 = vld [vmem:[%s3446_s1 + $0x5a8] sm:$0x1]  ;;  %v42_v42 = vld [vmem:[%s3447_s0 + $0xe0] sm:$0xff]  ;;  %v2240_v44 = vpack.c.bf16 %v271_v37, %v221_v36  ;;  %v220_v46 = vld [vmem:[%s3446_s1 + $0x350] sm:$0xff] }
  0x1c   :  { %v2336_v45 = vpack.c.bf16 %v295_v39, %v245_v38  ;;  %v270_v47 = vld [vmem:[%s3446_s1 + $0x4e0] sm:$0x1]  ;;  %v69_v48 = vld [vmem:[%s3447_s0 + $0x1b8] sm:$0xff]  ;;  %v244_v49 = vld [vmem:[%s3446_s1 + $0x410] sm:$0xff] }
  0x1d   :  { %2227 = vmatpush1.bf16.xpose.msra.mxu1 %v2226_v60  ;;  %v93_v50 = vld [vmem:[%s3447_s0 + $0x278] sm:$0xff]  ;;  %v68_v51 = vld [vmem:[%s3447_s0 + $0x1b0] sm:$0xff]  ;;  %v294_v52 = vld [vmem:[%s3446_s1 + $0x5a0] sm:$0x1]  ;;  %v2242_v60 = vpack.c.bf16 %v270_v47, %v220_v46 }
  0x1e   :  { %2323 = vmatpush1.bf16.xpose.msra.mxu0 %v2322_v61  ;;  %2229 = vmatprep.subr.bf16.mxu1 %v2228_v62  ;;  %v92_v53 = vld [vmem:[%s3447_s0 + $0x270] sm:$0xff]  ;;  %v21_v54 = vld [vmem:[%s3447_s0 + $0x38] sm:$0xff]  ;;  %v123_v55 = vld [vmem:[%s3446_s1 + $0x48] sm:$0xff]  ;;  %v2338_v61 = vpack.c.bf16 %v294_v52, %v244_v49 }
  0x1f   :  { %2325 = vmatprep.subr.bf16.mxu0 %v2324_v63  ;;  %v173_v56 = vld [vmem:[%s3446_s1 + $0x1d8] sm:$0xff]  ;;  %v147_v58 = vld [vmem:[%s3446_s1 + $0x108] sm:$0xff]  ;;  %v122_v0 = vld [vmem:[%s3446_s1 + $0x40] sm:$0xff] }
  0x20   :  { %v45_v57 = vld [vmem:[%s3447_s0 + $0xf8] sm:$0xff]  ;;  %v2244_v62 = vpack.c.bf16 %v173_v56, %v123_v55  ;;  %v172_v1 = vld [vmem:[%s3446_s1 + $0x1d0] sm:$0xff]  ;;  %v146_v2 = vld [vmem:[%s3446_s1 + $0x100] sm:$0xff] }
  0x21   :  { %v197_v59 = vld [vmem:[%s3446_s1 + $0x298] sm:$0xff]  ;;  %v196_v3 = vld [vmem:[%s3446_s1 + $0x290] sm:$0xff]  ;;  %v223_v4 = vld [vmem:[%s3446_s1 + $0x368] sm:$0xff] }
  0x22   :  { %v2340_v63 = vpack.c.bf16 %v197_v59, %v147_v58  ;;  %v273_v5 = vld [vmem:[%s3446_s1 + $0x4f8] sm:$0x1]  ;;  %v247_v6 = vld [vmem:[%s3446_s1 + $0x428] sm:$0xff]  ;;  %v222_v14 = vld [vmem:[%s3446_s1 + $0x360] sm:$0xff] }
  0x23   :  { %v297_v7 = vld [vmem:[%s3446_s1 + $0x5b8] sm:$0x1]  ;;  %v272_v15 = vld [vmem:[%s3446_s1 + $0x4f0] sm:$0x1]  ;;  %v246_v17 = vld [vmem:[%s3446_s1 + $0x420] sm:$0xff] }
  0x24   :  { %466 = vmatmul.mubr.f32.vlgmr.msra.gmra.mrb[0].mxu1 %v16_v8  ;;  %v20_v8 = vld [vmem:[%s3447_s0 + $0x30] sm:$0xff]  ;;  %v125_v23 = vld [vmem:[%s3446_s1 + $0x58] sm:$0xff]  ;;  %v175_v24 = vld [vmem:[%s3446_s1 + $0x1e8] sm:$0xff] }
  0x25   :  { %2231 = vmatpush1.bf16.xpose.msra.mxu1 %v2230_v9  ;;  %1366 = vmatmul.mubr.f32.vlgmr.msra.gmra.mrb[0].mxu0 %v40_v10  ;;  %v2246_v9 = vpack.c.bf16 %v172_v1, %v122_v0  ;;  %v44_v10 = vld [vmem:[%s3447_s0 + $0xf0] sm:$0xff]  ;;  %v149_v26 = vld [vmem:[%s3446_s1 + $0x118] sm:$0xff]  ;;  %v199_v27 = vld [vmem:[%s3446_s1 + $0x2a8] sm:$0xff] }
  0x26   :  { %2327 = vmatpush1.bf16.xpose.msra.mxu0 %v2326_v11  ;;  %2233 = vmatprep.subr.bf16.mxu1 %v2232_v12  ;;  %v2342_v11 = vpack.c.bf16 %v196_v3, %v146_v2  ;;  %v2248_v12 = vpack.c.bf16 %v273_v5, %v223_v4  ;;  %v296_v20 = vld [vmem:[%s3446_s1 + $0x5b0] sm:$0x1]  ;;  %v174_v33 = vld [vmem:[%s3446_s1 + $0x1e0] sm:$0xff]  ;;  %v225_v36 = vld [vmem:[%s3446_s1 + $0x378] sm:$0xff] }
  0x27   :  { %2329 = vmatprep.subr.bf16.mxu0 %v2328_v13  ;;  %470 = vmatprep.mubr.f32.mxu1 %v67_v16  ;;  %v2344_v13 = vpack.c.bf16 %v297_v7, %v247_v6  ;;  %v71_v16 = vld [vmem:[%s3447_s0 + $0x1c8] sm:$0xff]  ;;  %v124_v32 = vld [vmem:[%s3446_s1 + $0x50] sm:$0xff]  ;;  %v198_v35 = vld [vmem:[%s3446_s1 + $0x2a0] sm:$0xff] }
  0x28   :  { %1370 = vmatprep.mubr.f32.mxu0 %v91_v18  ;;  %471 = vmatmul.mubr.f32.gmra.mrb[2].mxu1 %v66_v19  ;;  %v95_v18 = vld [vmem:[%s3447_s0 + $0x288] sm:$0xff]  ;;  %v70_v19 = vld [vmem:[%s3447_s0 + $0x1c0] sm:$0xff]  ;;  %v148_v34 = vld [vmem:[%s3446_s1 + $0x110] sm:$0xff] }
  0x29   :  { %1371 = vmatmul.mubr.f32.gmra.mrb[2].mxu0 %v90_v21  ;;  %540 = vmatprep.mubr.f32.mxu1 %v19_v22  ;;  %v94_v21 = vld [vmem:[%s3447_s0 + $0x280] sm:$0xff]  ;;  %v23_v22 = vld [vmem:[%s3447_s0 + $0x48] sm:$0xff]  ;;  %v249_v38 = vld [vmem:[%s3446_s1 + $0x438] sm:$0xff] }
  0x2a   :  { %1440 = vmatprep.mubr.f32.mxu0 %v43_v25  ;;  %v47_v25 = vld [vmem:[%s3447_s0 + $0x108] sm:$0xff]  ;;  %v224_v46 = vld [vmem:[%s3446_s1 + $0x370] sm:$0xff]  ;;  %v274_v47 = vld [vmem:[%s3446_s1 + $0x500] sm:$0x1] }
  0x2b   :  { %v275_v37 = vld [vmem:[%s3446_s1 + $0x508] sm:$0x1]  ;;  %v248_v49 = vld [vmem:[%s3446_s1 + $0x430] sm:$0xff]  ;;  %v298_v52 = vld [vmem:[%s3446_s1 + $0x5c0] sm:$0x1] }
  0x2c   :  { %v299_v39 = vld [vmem:[%s3446_s1 + $0x5c8] sm:$0x1]  ;;  %v177_v56 = vld [vmem:[%s3446_s1 + $0x1f8] sm:$0xff]  ;;  %v126_v1 = vld [vmem:[%s3446_s1 + $0x60] sm:$0xff] }
  0x2d   :  { %2235 = vmatpush1.bf16.xpose.msra.mxu1 %v2234_v28  ;;  %v2250_v28 = vpack.c.bf16 %v272_v15, %v222_v14  ;;  %v127_v55 = vld [vmem:[%s3446_s1 + $0x68] sm:$0xff]  ;;  %v201_v59 = vld [vmem:[%s3446_s1 + $0x2b8] sm:$0xff]  ;;  %v176_v2 = vld [vmem:[%s3446_s1 + $0x1f0] sm:$0xff] }
  0x2e   :  { %2331 = vmatpush1.bf16.xpose.msra.mxu0 %v2330_v29  ;;  %2237 = vmatprep.subr.bf16.mxu1 %v2236_v30  ;;  %v2346_v29 = vpack.c.bf16 %v296_v20, %v246_v17  ;;  %v2252_v30 = vpack.c.bf16 %v175_v24, %v125_v23  ;;  %v151_v58 = vld [vmem:[%s3446_s1 + $0x128] sm:$0xff]  ;;  %v150_v3 = vld [vmem:[%s3446_s1 + $0x120] sm:$0xff]  ;;  %v200_v4 = vld [vmem:[%s3446_s1 + $0x2b0] sm:$0xff] }
  0x2f   :  { %2333 = vmatprep.subr.bf16.mxu0 %v2332_v31  ;;  %v2348_v31 = vpack.c.bf16 %v199_v27, %v149_v26  ;;  %v2356_v0 = vpack.c.bf16 %v201_v59, %v151_v58  ;;  %v227_v5 = vld [vmem:[%s3446_s1 + $0x388] sm:$0xff]  ;;  %v277_v6 = vld [vmem:[%s3446_s1 + $0x518] sm:$0x1]  ;;  %v226_v15 = vld [vmem:[%s3446_s1 + $0x380] sm:$0xff] }
  0x30   :  { %v251_v7 = vld [vmem:[%s3446_s1 + $0x448] sm:$0xff]  ;;  %v129_v24 = vld [vmem:[%s3446_s1 + $0x78] sm:$0xff] }
  0x31   :  { %v75_v17 = vld [vmem:[%s3447_s0 + $0x1e8] sm:$0xff]  ;;  %v181_v59 = vld [vmem:[%s3446_s1 + $0x218] sm:$0xff] }
  0x32   :  { %v99_v20 = vld [vmem:[%s3447_s0 + $0x2a8] sm:$0xff] }
  0x33   :  { %v27_v23 = vld [vmem:[%s3447_s0 + $0x68] sm:$0xff] }
  0x34   :  { %541 = vmatmul.mubr.f32.vlgmr.msra.gmra.mrb[0].mxu1 %v18_v40  ;;  %v22_v40 = vld [vmem:[%s3447_s0 + $0x40] sm:$0xff]  ;;  %v51_v26 = vld [vmem:[%s3447_s0 + $0x128] sm:$0xff] }
  0x35   :  { %2239 = vmatpush1.bf16.xpose.msra.mxu1 %v2238_v41  ;;  %1441 = vmatmul.mubr.f32.vlgmr.msra.gmra.mrb[0].mxu0 %v42_v42  ;;  %v2254_v41 = vpack.c.bf16 %v174_v33, %v124_v32  ;;  %v46_v42 = vld [vmem:[%s3447_s0 + $0x100] sm:$0xff]  ;;  %v315_v27 = vld [vmem:[%s3448_s2 + $0x8] sm:$0xff] }
  0x36   :  { %2335 = vmatpush1.bf16.xpose.msra.mxu0 %v2334_v43  ;;  %2241 = vmatprep.subr.bf16.mxu1 %v2240_v44  ;;  %v2350_v43 = vpack.c.bf16 %v198_v35, %v148_v34  ;;  %v2256_v44 = vpack.c.bf16 %v275_v37, %v225_v36  ;;  %v314_v34 = vld [vmem:[%s3448_s2] sm:$0xff]  ;;  %v128_v35 = vld [vmem:[%s3446_s1 + $0x70] sm:$0xff]  ;;  %v131_v58 = vld [vmem:[%s3446_s1 + $0x88] sm:$0xff] }
  0x37   :  { %2337 = vmatprep.subr.bf16.mxu0 %v2336_v45  ;;  %545 = vmatprep.mubr.f32.mxu1 %v69_v48  ;;  %v2352_v45 = vpack.c.bf16 %v299_v39, %v249_v38  ;;  %v73_v48 = vld [vmem:[%s3447_s0 + $0x1d8] sm:$0xff]  ;;  %v178_v36 = vld [vmem:[%s3446_s1 + $0x200] sm:$0xff]  ;;  %v152_v37 = vld [vmem:[%s3446_s1 + $0x130] sm:$0xff] }
  0x38   :  { %1445 = vmatprep.mubr.f32.mxu0 %v93_v50  ;;  %546 = vmatmul.mubr.f32.gmra.mrb[2].mxu1 %v68_v51  ;;  %v97_v50 = vld [vmem:[%s3447_s0 + $0x298] sm:$0xff]  ;;  %v72_v51 = vld [vmem:[%s3447_s0 + $0x1d0] sm:$0xff]  ;;  %v202_v38 = vld [vmem:[%s3446_s1 + $0x2c0] sm:$0xff] }
  0x39   :  { %1446 = vmatmul.mubr.f32.gmra.mrb[2].mxu0 %v92_v53  ;;  %615 = vmatprep.mubr.f32.mxu1 %v21_v54  ;;  %v96_v53 = vld [vmem:[%s3447_s0 + $0x290] sm:$0xff]  ;;  %v25_v54 = vld [vmem:[%s3447_s0 + $0x58] sm:$0xff] }
  0x3a   :  { %1515 = vmatprep.mubr.f32.mxu0 %v45_v57  ;;  %v49_v57 = vld [vmem:[%s3447_s0 + $0x118] sm:$0xff] }
  0x3b   :  { %v229_v39 = vld [vmem:[%s3446_s1 + $0x398] sm:$0xff] }
  0x3d   :  { %2243 = vmatpush1.bf16.xpose.msra.mxu1 %v2242_v60  ;;  %v2258_v60 = vpack.c.bf16 %v274_v47, %v224_v46  ;;  %v2366_v46 = vpack.c.bf16 %v202_v38, %v152_v37  ;;  %v156_v37 = vld [vmem:[%s3446_s1 + $0x150] sm:$0xff]  ;;  %v206_v38 = vld [vmem:[%s3446_s1 + $0x2e0] sm:$0xff] }
  0x3e   :  { %2339 = vmatpush1.bf16.xpose.msra.mxu0 %v2338_v61  ;;  %2245 = vmatprep.subr.bf16.mxu1 %v2244_v62  ;;  %v2354_v61 = vpack.c.bf16 %v298_v52, %v248_v49  ;;  %v2260_v62 = vpack.c.bf16 %v177_v56, %v127_v55  ;;  %v228_v49 = vld [vmem:[%s3446_s1 + $0x390] sm:$0xff]  ;;  %v302_v55 = vld [vmem:[%s3446_s1 + $0x5e0] sm:$0x1] }
  0x3f   :  { %2341 = vmatprep.subr.bf16.mxu0 %v2340_v63  ;;  %v2513_v63 = vmov 0   ;;  %v252_v52 = vld [vmem:[%s3446_s1 + $0x450] sm:$0xff] }
  0x40   :  { %2512 = vset.pattern.permute.xlu0 %v2513_v63  ;;  %v100_v56 = vld [vmem:[%s3447_s0 + $0x2b0] sm:$0xff] }
  0x41   :  { %323 = vperm.xlu0 %2512, %v315_v27   ;;  %v183_v27 = vld [vmem:[%s3446_s1 + $0x228] sm:$0xff] }
  0x44   :  { %616 = vmatmul.mubr.f32.vlgmr.msra.gmra.mrb[0].mxu1 %v20_v8  ;;  %v301_v8 = vld [vmem:[%s3446_s1 + $0x5d8] sm:$0x1] }
  0x45   :  { %2247 = vmatpush1.bf16.xpose.msra.mxu1 %v2246_v9  ;;  %1516 = vmatmul.mubr.f32.vlgmr.msra.gmra.mrb[0].mxu0 %v44_v10  ;;  %v24_v9 = vld [vmem:[%s3447_s0 + $0x50] sm:$0xff]  ;;  %v2262_v10 = vpack.c.bf16 %v176_v2, %v126_v1  ;;  %v2360_v14 = vpack.c.bf16 %v301_v8, %v251_v7  ;;  %v2276_v1 = vpack.c.bf16 %v181_v59, %v131_v58  ;;  %v231_v7 = vld [vmem:[%s3446_s1 + $0x3a8] sm:$0xff]  ;;  %v281_v8 = vld [vmem:[%s3446_s1 + $0x538] sm:$0x1] }
  0x46   :  { %2343 = vmatpush1.bf16.xpose.msra.mxu0 %v2342_v11  ;;  %2249 = vmatprep.subr.bf16.mxu1 %v2248_v12  ;;  %v48_v11 = vld [vmem:[%s3447_s0 + $0x110] sm:$0xff]  ;;  %v2358_v12 = vpack.c.bf16 %v200_v4, %v150_v3  ;;  %v130_v3 = vld [vmem:[%s3446_s1 + $0x80] sm:$0xff]  ;;  %v135_v58 = vld [vmem:[%s3446_s1 + $0xa8] sm:$0xff] }
  0x47   :  { %2345 = vmatprep.subr.bf16.mxu0 %v2344_v13  ;;  %620 = vmatprep.mubr.f32.mxu1 %v71_v16  ;;  %v2264_v13 = vpack.c.bf16 %v277_v6, %v227_v5  ;;  %v276_v16 = vld [vmem:[%s3446_s1 + $0x510] sm:$0x1]  ;;  %v154_v5 = vld [vmem:[%s3446_s1 + $0x140] sm:$0xff]  ;;  %v185_v59 = vld [vmem:[%s3446_s1 + $0x238] sm:$0xff] }
  0x48   :  { %1520 = vmatprep.mubr.f32.mxu0 %v95_v18  ;;  %621 = vmatmul.mubr.f32.gmra.mrb[2].mxu1 %v70_v19  ;;  %v250_v18 = vld [vmem:[%s3446_s1 + $0x440] sm:$0xff]  ;;  %v300_v19 = vld [vmem:[%s3446_s1 + $0x5d0] sm:$0x1] }
  0x49   :  { %1521 = vmatmul.mubr.f32.gmra.mrb[2].mxu0 %v94_v21  ;;  %690 = vmatprep.mubr.f32.mxu1 %v23_v22  ;;  %v74_v21 = vld [vmem:[%s3447_s0 + $0x1e0] sm:$0xff]  ;;  %v180_v4 = vld [vmem:[%s3446_s1 + $0x210] sm:$0xff] }
  0x4a   :  { %1590 = vmatprep.mubr.f32.mxu0 %v47_v25  ;;  %v98_v22 = vld [vmem:[%s3447_s0 + $0x2a0] sm:$0xff]  ;;  %v179_v25 = vld [vmem:[%s3446_s1 + $0x208] sm:$0xff]  ;;  %318 = vperm.xlu0 %2512, %v314_v34   ;;  %v204_v6 = vld [vmem:[%s3446_s1 + $0x2d0] sm:$0xff] }
  0x4b   :  { %v2268_v32 = vpack.c.bf16 %v179_v25, %v129_v24  ;;  %v102_v24 = vld [vmem:[%s3447_s0 + $0x2c0] sm:$0xff]  ;;  %v31_v25 = vld [vmem:[%s3447_s0 + $0x88] sm:$0xff] }
  0x4d   :  { %2251 = vmatpush1.bf16.xpose.msra.mxu1 %v2250_v28  ;;  %v153_v28 = vld [vmem:[%s3446_s1 + $0x138] sm:$0xff] }
  0x4e   :  { %2347 = vmatpush1.bf16.xpose.msra.mxu0 %v2346_v29  ;;  %2253 = vmatprep.subr.bf16.mxu1 %v2252_v30  ;;  %v203_v29 = vld [vmem:[%s3446_s1 + $0x2c8] sm:$0xff]  ;;  %v2266_v30 = vpack.c.bf16 %v276_v16, %v226_v15  ;;  %v2280_v15 = vpack.c.bf16 %v281_v8, %v231_v7  ;;  %v285_v8 = vld [vmem:[%s3446_s1 + $0x558] sm:$0x1] }
  0x4f   :  { %2349 = vmatprep.subr.bf16.mxu0 %v2348_v31  ;;  %v2362_v31 = vpack.c.bf16 %v300_v19, %v250_v18  ;;  %v2364_v33 = vpack.c.bf16 %v203_v29, %v153_v28  ;;  %v280_v18 = vld [vmem:[%s3446_s1 + $0x530] sm:$0x1]  ;;  %v79_v19 = vld [vmem:[%s3447_s0 + $0x208] sm:$0xff]  ;;  %v157_v29 = vld [vmem:[%s3446_s1 + $0x158] sm:$0xff] }
  0x50   :  { %v55_v28 = vld [vmem:[%s3447_s0 + $0x148] sm:$0xff] }
  0x51   :  { %v235_v7 = vld [vmem:[%s3446_s1 + $0x3c8] sm:$0xff] }
  0x54   :  { %691 = vmatmul.mubr.f32.vlgmr.msra.gmra.mrb[0].mxu1 %v22_v40  ;;  %v279_v40 = vld [vmem:[%s3446_s1 + $0x528] sm:$0x1] }
  0x55   :  { %2255 = vmatpush1.bf16.xpose.msra.mxu1 %v2254_v41  ;;  %1591 = vmatmul.mubr.f32.vlgmr.msra.gmra.mrb[0].mxu0 %v46_v42  ;;  %v253_v41 = vld [vmem:[%s3446_s1 + $0x458] sm:$0xff]  ;;  %v303_v42 = vld [vmem:[%s3446_s1 + $0x5e8] sm:$0x1]  ;;  %v2272_v47 = vpack.c.bf16 %v279_v40, %v229_v39 }
  0x56   :  { %2351 = vmatpush1.bf16.xpose.msra.mxu0 %v2350_v43  ;;  %2257 = vmatprep.subr.bf16.mxu1 %v2256_v44  ;;  %v26_v43 = vld [vmem:[%s3447_s0 + $0x60] sm:$0xff]  ;;  %v2270_v44 = vpack.c.bf16 %v178_v36, %v128_v35  ;;  %v132_v35 = vld [vmem:[%s3446_s1 + $0x90] sm:$0xff]  ;;  %v233_v39 = vld [vmem:[%s3446_s1 + $0x3b8] sm:$0xff] }
  0x57   :  { %2353 = vmatprep.subr.bf16.mxu0 %v2352_v45  ;;  %695 = vmatprep.mubr.f32.mxu1 %v73_v48  ;;  %v50_v45 = vld [vmem:[%s3447_s0 + $0x120] sm:$0xff]  ;;  %v2368_v48 = vpack.c.bf16 %v303_v42, %v253_v41  ;;  %v283_v40 = vld [vmem:[%s3446_s1 + $0x548] sm:$0x1]  ;;  %v257_v41 = vld [vmem:[%s3446_s1 + $0x478] sm:$0xff] }
  0x58   :  { %1595 = vmatprep.mubr.f32.mxu0 %v97_v50  ;;  %696 = vmatmul.mubr.f32.gmra.mrb[2].mxu1 %v72_v51  ;;  %v278_v50 = vld [vmem:[%s3446_s1 + $0x520] sm:$0x1]  ;;  %v77_v51 = vld [vmem:[%s3447_s0 + $0x1f8] sm:$0xff]  ;;  %v307_v42 = vld [vmem:[%s3446_s1 + $0x608] sm:$0x1] }
  0x59   :  { %1596 = vmatmul.mubr.f32.gmra.mrb[2].mxu0 %v96_v53  ;;  %765 = vmatprep.mubr.f32.mxu1 %v25_v54  ;;  %v101_v53 = vld [vmem:[%s3447_s0 + $0x2b8] sm:$0xff]  ;;  %v76_v54 = vld [vmem:[%s3447_s0 + $0x1f0] sm:$0xff]  ;;  %v2274_v63 = vpack.c.bf16 %v278_v50, %v228_v49  ;;  %v182_v36 = vld [vmem:[%s3446_s1 + $0x220] sm:$0xff] }
  0x5a   :  { %1665 = vmatprep.mubr.f32.mxu0 %v49_v57  ;;  %v29_v57 = vld [vmem:[%s3447_s0 + $0x78] sm:$0xff]  ;;  %v232_v49 = vld [vmem:[%s3446_s1 + $0x3b0] sm:$0xff]  ;;  %v282_v50 = vld [vmem:[%s3446_s1 + $0x540] sm:$0x1] }
  0x5d   :  { %2259 = vmatpush1.bf16.xpose.msra.mxu1 %v2258_v60  ;;  %v53_v60 = vld [vmem:[%s3447_s0 + $0x138] sm:$0xff] }
  0x5e   :  { %2355 = vmatpush1.bf16.xpose.msra.mxu0 %v2354_v61  ;;  %2261 = vmatprep.subr.bf16.mxu1 %v2260_v62  ;;  %v155_v61 = vld [vmem:[%s3446_s1 + $0x148] sm:$0xff]  ;;  %v205_v62 = vld [vmem:[%s3446_s1 + $0x2d8] sm:$0xff] }
  0x5f   :  { %2357 = vmatprep.subr.bf16.mxu0 %v2356_v0  ;;  %v2370_v0 = vpack.c.bf16 %v302_v55, %v252_v52  ;;  %v2372_v2 = vpack.c.bf16 %v205_v62, %v155_v61  ;;  %v256_v52 = vld [vmem:[%s3446_s1 + $0x470] sm:$0xff]  ;;  %v306_v55 = vld [vmem:[%s3446_s1 + $0x600] sm:$0x1]  ;;  %v159_v61 = vld [vmem:[%s3446_s1 + $0x168] sm:$0xff] }
  0x60   :  { %v209_v62 = vld [vmem:[%s3446_s1 + $0x2f8] sm:$0xff] }
  0x64   :  { %766 = vmatmul.mubr.f32.vlgmr.msra.gmra.mrb[0].mxu1 %v24_v9  ;;  %v255_v9 = vld [vmem:[%s3446_s1 + $0x468] sm:$0xff] }
  0x65   :  { %2263 = vmatpush1.bf16.xpose.msra.mxu1 %v2262_v10  ;;  %1666 = vmatmul.mubr.f32.vlgmr.msra.gmra.mrb[0].mxu0 %v48_v11  ;;  %v305_v10 = vld [vmem:[%s3446_s1 + $0x5f8] sm:$0x1]  ;;  %v28_v11 = vld [vmem:[%s3447_s0 + $0x70] sm:$0xff] }
  0x66   :  { %2359 = vmatpush1.bf16.xpose.msra.mxu0 %v2358_v12  ;;  %2265 = vmatprep.subr.bf16.mxu1 %v2264_v13  ;;  %v2278_v12 = vpack.c.bf16 %v180_v4, %v130_v3  ;;  %v52_v13 = vld [vmem:[%s3447_s0 + $0x130] sm:$0xff]  ;;  %v2376_v16 = vpack.c.bf16 %v305_v10, %v255_v9  ;;  %v134_v3 = vld [vmem:[%s3446_s1 + $0xa0] sm:$0xff]  ;;  %v259_v9 = vld [vmem:[%s3446_s1 + $0x488] sm:$0xff] }
  0x67   :  { %2361 = vmatprep.subr.bf16.mxu0 %v2360_v14  ;;  %770 = vmatprep.mubr.f32.mxu1 %v75_v17  ;;  %v2374_v14 = vpack.c.bf16 %v204_v6, %v154_v5  ;;  %v230_v17 = vld [vmem:[%s3446_s1 + $0x3a0] sm:$0xff]  ;;  %v184_v4 = vld [vmem:[%s3446_s1 + $0x230] sm:$0xff]  ;;  %v309_v10 = vld [vmem:[%s3446_s1 + $0x618] sm:$0x1] }
  0x68   :  { %1670 = vmatprep.mubr.f32.mxu0 %v99_v20  ;;  %771 = vmatmul.mubr.f32.gmra.mrb[2].mxu1 %v74_v21  ;;  %v254_v20 = vld [vmem:[%s3446_s1 + $0x460] sm:$0xff]  ;;  %v103_v21 = vld [vmem:[%s3447_s0 + $0x2c8] sm:$0xff]  ;;  %v208_v6 = vld [vmem:[%s3446_s1 + $0x2f0] sm:$0xff] }
  0x69   :  { %1671 = vmatmul.mubr.f32.gmra.mrb[2].mxu0 %v98_v22  ;;  %840 = vmatprep.mubr.f32.mxu1 %v27_v23  ;;  %v78_v22 = vld [vmem:[%s3447_s0 + $0x200] sm:$0xff]  ;;  %v304_v23 = vld [vmem:[%s3446_s1 + $0x5f0] sm:$0x1] }
  0x6a   :  { %1740 = vmatprep.mubr.f32.mxu0 %v51_v26  ;;  %v133_v26 = vld [vmem:[%s3446_s1 + $0x98] sm:$0xff]  ;;  %v158_v5 = vld [vmem:[%s3446_s1 + $0x160] sm:$0xff] }
  0x6d   :  { %2267 = vmatpush1.bf16.xpose.msra.mxu1 %v2266_v30  ;;  %v207_v30 = vld [vmem:[%s3446_s1 + $0x2e8] sm:$0xff] }
  0x6e   :  { %2363 = vmatpush1.bf16.xpose.msra.mxu0 %v2362_v31  ;;  %2269 = vmatprep.subr.bf16.mxu1 %v2268_v32  ;;  %v2282_v31 = vpack.c.bf16 %v280_v18, %v230_v17  ;;  %v2378_v32 = vpack.c.bf16 %v304_v23, %v254_v20  ;;  %v2380_v34 = vpack.c.bf16 %v207_v30, %v157_v29  ;;  %v234_v17 = vld [vmem:[%s3446_s1 + $0x3c0] sm:$0xff]  ;;  %v284_v18 = vld [vmem:[%s3446_s1 + $0x550] sm:$0x1]  ;;  %v161_v29 = vld [vmem:[%s3446_s1 + $0x178] sm:$0xff] }
  0x6f   :  { %2365 = vmatprep.subr.bf16.mxu0 %v2364_v33  ;;  %v2284_v33 = vpack.c.bf16 %v183_v27, %v133_v26  ;;  %v258_v20 = vld [vmem:[%s3446_s1 + $0x480] sm:$0xff]  ;;  %v308_v23 = vld [vmem:[%s3446_s1 + $0x610] sm:$0x1]  ;;  %v137_v26 = vld [vmem:[%s3446_s1 + $0xb8] sm:$0xff] }
  0x70   :  { %v187_v27 = vld [vmem:[%s3446_s1 + $0x248] sm:$0xff] }
  0x71   :  { %v211_v30 = vld [vmem:[%s3446_s1 + $0x308] sm:$0xff] }
  0x74   :  { %841 = vmatmul.mubr.f32.vlgmr.msra.gmra.mrb[0].mxu1 %v26_v43  ;;  %v30_v43 = vld [vmem:[%s3447_s0 + $0x80] sm:$0xff] }
  0x75   :  { %2271 = vmatpush1.bf16.xpose.msra.mxu1 %v2270_v44  ;;  %1741 = vmatmul.mubr.f32.vlgmr.msra.gmra.mrb[0].mxu0 %v50_v45  ;;  %v2286_v44 = vpack.c.bf16 %v182_v36, %v132_v35  ;;  %v54_v45 = vld [vmem:[%s3447_s0 + $0x140] sm:$0xff]  ;;  %v136_v35 = vld [vmem:[%s3446_s1 + $0xb0] sm:$0xff] }
  0x76   :  { %2367 = vmatpush1.bf16.xpose.msra.mxu0 %v2366_v46  ;;  %2273 = vmatprep.subr.bf16.mxu1 %v2272_v47  ;;  %v2382_v46 = vpack.c.bf16 %v206_v38, %v156_v37  ;;  %v2288_v47 = vpack.c.bf16 %v283_v40, %v233_v39  ;;  %v186_v36 = vld [vmem:[%s3446_s1 + $0x240] sm:$0xff]  ;;  %v160_v37 = vld [vmem:[%s3446_s1 + $0x170] sm:$0xff]  ;;  %v237_v39 = vld [vmem:[%s3446_s1 + $0x3d8] sm:$0xff] }
  0x77   :  { %2369 = vmatprep.subr.bf16.mxu0 %v2368_v48  ;;  %845 = vmatprep.mubr.f32.mxu1 %v77_v51  ;;  %v2384_v48 = vpack.c.bf16 %v307_v42, %v257_v41  ;;  %v81_v51 = vld [vmem:[%s3447_s0 + $0x218] sm:$0xff]  ;;  %v210_v38 = vld [vmem:[%s3446_s1 + $0x300] sm:$0xff]  ;;  %v287_v40 = vld [vmem:[%s3446_s1 + $0x568] sm:$0x1] }
  0x78   :  { %1745 = vmatprep.mubr.f32.mxu0 %v101_v53  ;;  %846 = vmatmul.mubr.f32.gmra.mrb[2].mxu1 %v76_v54  ;;  %v105_v53 = vld [vmem:[%s3447_s0 + $0x2d8] sm:$0xff]  ;;  %v80_v54 = vld [vmem:[%s3447_s0 + $0x210] sm:$0xff]  ;;  %v311_v42 = vld [vmem:[%s3446_s1 + $0x628] sm:$0x1] }
  0x79   :  { %1746 = vmatmul.mubr.f32.gmra.mrb[2].mxu0 %v100_v56  ;;  %915 = vmatprep.mubr.f32.mxu1 %v29_v57  ;;  %v104_v56 = vld [vmem:[%s3447_s0 + $0x2d0] sm:$0xff]  ;;  %v33_v57 = vld [vmem:[%s3447_s0 + $0x98] sm:$0xff] }
  0x7a   :  { %1815 = vmatprep.mubr.f32.mxu0 %v53_v60  ;;  %v57_v60 = vld [vmem:[%s3447_s0 + $0x158] sm:$0xff] }
  0x7b   :  { %v261_v41 = vld [vmem:[%s3446_s1 + $0x498] sm:$0xff] }
  0x7d   :  { %2275 = vmatpush1.bf16.xpose.msra.mxu1 %v2274_v63  ;;  %v2290_v63 = vpack.c.bf16 %v282_v50, %v232_v49  ;;  %v236_v49 = vld [vmem:[%s3446_s1 + $0x3d0] sm:$0xff]  ;;  %v286_v50 = vld [vmem:[%s3446_s1 + $0x560] sm:$0x1] }
  0x7e   :  { %2371 = vmatpush1.bf16.xpose.msra.mxu0 %v2370_v0  ;;  %2277 = vmatprep.subr.bf16.mxu1 %v2276_v1  ;;  %v2386_v0 = vpack.c.bf16 %v306_v55, %v256_v52  ;;  %v2292_v1 = vpack.c.bf16 %v185_v59, %v135_v58  ;;  %v260_v52 = vld [vmem:[%s3446_s1 + $0x490] sm:$0xff]  ;;  %v310_v55 = vld [vmem:[%s3446_s1 + $0x620] sm:$0x1]  ;;  %v61_v58 = vld [vmem:[%s3447_s0 + $0x178] sm:$0xff] }
  0x7f   :  { %2373 = vmatprep.subr.bf16.mxu0 %v2372_v2  ;;  %v2388_v2 = vpack.c.bf16 %v209_v62, %v159_v61  ;;  %v163_v59 = vld [vmem:[%s3446_s1 + $0x188] sm:$0xff]  ;;  %v2306_v61 = vpack.c.bf16 %v286_v50, %v236_v49  ;;  %v2402_v62 = vpack.c.bf16 %v310_v55, %v260_v52 }
  0x84   :  { %916 = vmatmul.mubr.f32.vlgmr.msra.gmra.mrb[0].mxu1 %v28_v11  ;;  %v32_v11 = vld [vmem:[%s3447_s0 + $0x90] sm:$0xff] }
  0x85   :  { %2279 = vmatpush1.bf16.xpose.msra.mxu1 %v2278_v12  ;;  %1816 = vmatmul.mubr.f32.vlgmr.msra.gmra.mrb[0].mxu0 %v52_v13  ;;  %v2294_v12 = vpack.c.bf16 %v184_v4, %v134_v3  ;;  %v56_v13 = vld [vmem:[%s3447_s0 + $0x150] sm:$0xff]  ;;  %v313_v3 = vld [vmem:[%s3446_s1 + $0x638] sm:$0x1] }
  0x86   :  { %2375 = vmatpush1.bf16.xpose.msra.mxu0 %v2374_v14  ;;  %2281 = vmatprep.subr.bf16.mxu1 %v2280_v15  ;;  %v2390_v14 = vpack.c.bf16 %v208_v6, %v158_v5  ;;  %v2296_v15 = vpack.c.bf16 %v285_v8, %v235_v7  ;;  %v36_v4 = vld [vmem:[%s3447_s0 + $0xb0] sm:$0xff]  ;;  %v87_v7 = vld [vmem:[%s3447_s0 + $0x248] sm:$0xff] }
  0x87   :  { %2377 = vmatprep.subr.bf16.mxu0 %v2376_v16  ;;  %920 = vmatprep.mubr.f32.mxu1 %v79_v19  ;;  %v2392_v16 = vpack.c.bf16 %v309_v10, %v259_v9  ;;  %v83_v19 = vld [vmem:[%s3447_s0 + $0x228] sm:$0xff]  ;;  %v60_v6 = vld [vmem:[%s3447_s0 + $0x170] sm:$0xff]  ;;  %v86_v10 = vld [vmem:[%s3447_s0 + $0x240] sm:$0xff] }
  0x88   :  { %1820 = vmatprep.mubr.f32.mxu0 %v103_v21  ;;  %921 = vmatmul.mubr.f32.gmra.mrb[2].mxu1 %v78_v22  ;;  %v107_v21 = vld [vmem:[%s3447_s0 + $0x2e8] sm:$0xff]  ;;  %v82_v22 = vld [vmem:[%s3447_s0 + $0x220] sm:$0xff] }
  0x89   :  { %1821 = vmatmul.mubr.f32.gmra.mrb[2].mxu0 %v102_v24  ;;  %990 = vmatprep.mubr.f32.mxu1 %v31_v25  ;;  %v106_v24 = vld [vmem:[%s3447_s0 + $0x2e0] sm:$0xff]  ;;  %v35_v25 = vld [vmem:[%s3447_s0 + $0xa8] sm:$0xff] }
  0x8a   :  { %1890 = vmatprep.mubr.f32.mxu0 %v55_v28  ;;  %v59_v28 = vld [vmem:[%s3447_s0 + $0x168] sm:$0xff] }
  0x8b   :  { %v111_v9 = vld [vmem:[%s3447_s0 + $0x308] sm:$0xff] }
  0x8d   :  { %2283 = vmatpush1.bf16.xpose.msra.mxu1 %v2282_v31  ;;  %v2298_v31 = vpack.c.bf16 %v284_v18, %v234_v17  ;;  %v112_v17 = vld [vmem:[%s3447_s0 + $0x310] sm:$0xff]  ;;  %v62_v18 = vld [vmem:[%s3447_s0 + $0x180] sm:$0xff] }
  0x8e   :  { %2379 = vmatpush1.bf16.xpose.msra.mxu0 %v2378_v32  ;;  %2285 = vmatprep.subr.bf16.mxu1 %v2284_v33  ;;  %v2394_v32 = vpack.c.bf16 %v308_v23, %v258_v20  ;;  %v2300_v33 = vpack.c.bf16 %v187_v27, %v137_v26 }
  0x8f   :  { %2381 = vmatprep.subr.bf16.mxu0 %v2380_v34  ;;  %v2396_v34 = vpack.c.bf16 %v211_v30, %v161_v29 }
  0x94   :  { %991 = vmatmul.mubr.f32.vlgmr.msra.gmra.mrb[0].mxu1 %v30_v43  ;;  %v34_v43 = vld [vmem:[%s3447_s0 + $0xa0] sm:$0xff] }
  0x95   :  { %2287 = vmatpush1.bf16.xpose.msra.mxu1 %v2286_v44  ;;  %1891 = vmatmul.mubr.f32.vlgmr.msra.gmra.mrb[0].mxu0 %v54_v45  ;;  %v2302_v44 = vpack.c.bf16 %v186_v36, %v136_v35  ;;  %v58_v45 = vld [vmem:[%s3447_s0 + $0x160] sm:$0xff] }
  0x96   :  { %2383 = vmatpush1.bf16.xpose.msra.mxu0 %v2382_v46  ;;  %2289 = vmatprep.subr.bf16.mxu1 %v2288_v47  ;;  %v2398_v46 = vpack.c.bf16 %v210_v38, %v160_v37  ;;  %v2304_v47 = vpack.c.bf16 %v287_v40, %v237_v39 }
  0x97   :  { %2385 = vmatprep.subr.bf16.mxu0 %v2384_v48  ;;  %995 = vmatprep.mubr.f32.mxu1 %v81_v51  ;;  %v2400_v48 = vpack.c.bf16 %v311_v42, %v261_v41  ;;  %v85_v51 = vld [vmem:[%s3447_s0 + $0x238] sm:$0xff] }
  0x98   :  { %1895 = vmatprep.mubr.f32.mxu0 %v105_v53  ;;  %996 = vmatmul.mubr.f32.gmra.mrb[2].mxu1 %v80_v54  ;;  %v109_v53 = vld [vmem:[%s3447_s0 + $0x2f8] sm:$0xff]  ;;  %v84_v54 = vld [vmem:[%s3447_s0 + $0x230] sm:$0xff] }
  0x99   :  { %1896 = vmatmul.mubr.f32.gmra.mrb[2].mxu0 %v104_v56  ;;  %1065 = vmatprep.mubr.f32.mxu1 %v33_v57  ;;  %v108_v56 = vld [vmem:[%s3447_s0 + $0x2f0] sm:$0xff]  ;;  %v37_v57 = vld [vmem:[%s3447_s0 + $0xb8] sm:$0xff] }
  0x9a   :  { %1965 = vmatprep.mubr.f32.mxu0 %v57_v60  ;;  %v213_v60 = vld [vmem:[%s3446_s1 + $0x318] sm:$0xff] }
  0x9d   :  { %2291 = vmatpush1.bf16.xpose.msra.mxu1 %v2290_v63  ;;  %v2404_v63 = vpack.c.bf16 %v213_v60, %v163_v59 }
  0x9e   :  { %2387 = vmatpush1.bf16.xpose.msra.mxu0 %v2386_v0  ;;  %2293 = vmatprep.subr.bf16.mxu1 %v2292_v1  ;;  %v162_v0 = vld [vmem:[%s3446_s1 + $0x180] sm:$0xff]  ;;  %v212_v1 = vld [vmem:[%s3446_s1 + $0x310] sm:$0xff] }
  0x9f   :  { %2389 = vmatprep.subr.bf16.mxu0 %v2388_v2  ;;  %v263_v2 = vld [vmem:[%s3446_s1 + $0x4a8] sm:$0xff]  ;;  %v2406_v5 = vpack.c.bf16 %v212_v1, %v162_v0 }
  0xa0   :  { %v2408_v8 = vpack.c.bf16 %v313_v3, %v263_v2 }
  0xa4   :  { %1066 = vmatmul.mubr.f32.vlgmr.msra.gmra.mrb[0].mxu1 %v32_v11  ;;  %v110_v11 = vld [vmem:[%s3447_s0 + $0x300] sm:$0xff] }
  0xa5   :  { %2295 = vmatpush1.bf16.xpose.msra.mxu1 %v2294_v12  ;;  %1966 = vmatmul.mubr.f32.vlgmr.msra.gmra.mrb[0].mxu0 %v56_v13  ;;  %v262_v12 = vld [vmem:[%s3446_s1 + $0x4a0] sm:$0xff]  ;;  %v312_v13 = vld [vmem:[%s3446_s1 + $0x630] sm:$0x1] }
  0xa6   :  { %2391 = vmatpush1.bf16.xpose.msra.mxu0 %v2390_v14  ;;  %2297 = vmatprep.subr.bf16.mxu1 %v2296_v15  ;;  %v113_v14 = vld [vmem:[%s3447_s0 + $0x318] sm:$0xff]  ;;  %v63_v15 = vld [vmem:[%s3447_s0 + $0x188] sm:$0xff] }
  0xa7   :  { %2393 = vmatprep.subr.bf16.mxu0 %v2392_v16  ;;  %1070 = vmatprep.mubr.f32.mxu1 %v83_v19  ;;  %v2410_v16 = vpack.c.bf16 %v312_v13, %v262_v12 }
  0xa8   :  { %1970 = vmatprep.mubr.f32.mxu0 %v107_v21  ;;  %1071 = vmatmul.mubr.f32.gmra.mrb[2].mxu1 %v82_v22 }
  0xa9   :  { %1971 = vmatmul.mubr.f32.gmra.mrb[2].mxu0 %v106_v24  ;;  %1140 = vmatprep.mubr.f32.mxu1 %v35_v25 }
  0xaa   :  { %2040 = vmatprep.mubr.f32.mxu0 %v59_v28 }
  0xad   :  { %2299 = vmatpush1.bf16.xpose.msra.mxu1 %v2298_v31 }
  0xae   :  { %2395 = vmatpush1.bf16.xpose.msra.mxu0 %v2394_v32  ;;  %2301 = vmatprep.subr.bf16.mxu1 %v2300_v33 }
  0xaf   :  { %2397 = vmatprep.subr.bf16.mxu0 %v2396_v34 }
  0xb4   :  { %1141 = vmatmul.mubr.f32.vlgmr.msra.gmra.mrb[0].mxu1 %v34_v43 }
  0xb5   :  { %2303 = vmatpush1.bf16.xpose.msra.mxu1 %v2302_v44  ;;  %2041 = vmatmul.mubr.f32.vlgmr.msra.gmra.mrb[0].mxu0 %v58_v45 }
  0xb6   :  { %2399 = vmatpush1.bf16.xpose.msra.mxu0 %v2398_v46  ;;  %2305 = vmatprep.subr.bf16.mxu1 %v2304_v47 }
  0xb7   :  { %2401 = vmatprep.subr.bf16.mxu0 %v2400_v48  ;;  %1145 = vmatprep.mubr.f32.mxu1 %v85_v51 }
  0xb8   :  { %2045 = vmatprep.mubr.f32.mxu0 %v109_v53  ;;  %1146 = vmatmul.mubr.f32.gmra.mrb[2].mxu1 %v84_v54 }
  0xb9   :  { %2046 = vmatmul.mubr.f32.gmra.mrb[2].mxu0 %v108_v56  ;;  %1215 = vmatprep.mubr.f32.mxu1 %v37_v57 }
  0xba   :  { %2115 = vmatprep.mubr.f32.mxu0 %v61_v58 }
  0xbd   :  { %2307 = vmatpush1.bf16.xpose.msra.mxu1 %v2306_v61 }
  0xbe   :  { %2403 = vmatpush1.bf16.xpose.msra.mxu0 %v2402_v62  ;;  %2412 = vmatprep.subr.bf16.mxu1 %v2404_v63 }
  0xbf   :  { %2405 = vmatprep.subr.bf16.mxu0 %v2404_v63 }
  0xc0   :  { %v324_v21 = vpop.permute.xlu0 %323 }
  0xc4   :  { %1216 = vmatmul.mubr.f32.vlgmr.msra.gmra.mrb[0].mxu1 %v36_v4 }
  0xc5   :  { %2116 = vmatmul.mubr.f32.vlgmr.msra.gmra.mrb[0].mxu0 %v60_v6  ;;  %2414 = vmatpush1.bf16.xpose.msra.mxu1 %v2406_v5 }
  0xc6   :  { %2407 = vmatpush1.bf16.xpose.msra.mxu0 %v2406_v5  ;;  %1220 = vmatprep.mubr.f32.mxu1 %v87_v7 }
  0xc7   :  { %2120 = vmatprep.mubr.f32.mxu0 %v111_v9  ;;  %2409 = vmatprep.subr.bf16.mxu0 %v2408_v8 }
  0xc8   :  { %1221 = vmatmul.mubr.f32.gmra.mrb[2].mxu1 %v86_v10  ;;  %2413 = vmatprep.subr.bf16.mxu1 %v2408_v8 }
  0xc9   :  { %2121 = vmatmul.mubr.f32.gmra.mrb[2].mxu0 %v110_v11  ;;  %2195 = vmatprep.mubr.f32.mxu1 %v113_v14  ;;  %v319_v28 = vpop.permute.xlu0 %318 }
  0xca   :  { %2190 = vmatprep.mubr.f32.mxu0 %v63_v15 }
  0xcd   :  { %2415 = vmatpush1.bf16.xpose.msra.mxu1 %v2410_v16 }
  0xce   :  { %2411 = vmatpush1.bf16.xpose.msra.mxu0 %v2410_v16 }
  0xd4   :  { %2196 = vmatmul.mubr.f32.vlgmr.msra.gmra.mrb[4].mxu1 %v112_v17 }
  0xd5   :  { %2191 = vmatmul.mubr.f32.vlgmr.msra.gmra.mrb[0].mxu0 %v62_v18 }
 0x197   :  { %v1217_v19 = vpop.f32.mrb[0].mxu1 }
 0x198   :  { %v1219_v20 = vpop.f32.mrb[1].mxu1  ;;  %v2416_v29 = vadd.f32 %v1217_v19, %v319_v28 }
 0x19b   :  { %v1222_v22 = vpop.f32.mrb[2].mxu1 }
 0x19c   :  { %v2418_v23 = vadd.f32 %v1222_v22, %v324_v21  ;;  %v2122_v24 = vpop.f32.mrb[2].mxu0  ;;  %v1224_v25 = vpop.f32.mrb[3].mxu1 }
 0x19d   :  { %v2124_v26 = vpop.f32.mrb[3].mxu0 }
 0x19e   :  { %v2419_v27 = vadd.f32 %v2418_v23, %v2122_v24 }
 0x1a7   :  { %v2197_v30 = vpop.f32.mrb[4].mxu1 }
 0x1a8   :  { %v2192_v31 = vpop.f32.mrb[0].mxu0  ;;  %v2420_v32 = vadd.f32 %v2419_v27, %v2197_v30  ;;  %v2199_v33 = vpop.f32.mrb[5].mxu1 }
 0x1a9   :  { %v2417_v34 = vadd.f32 %v2416_v29, %v2192_v31  ;;  %v2194_v35 = vpop.f32.mrb[1].mxu0 }
 0x1aa   :  { %v2202_v36 = vmax.f32 %v2420_v32, 0.2 }
 0x1ab   :  { %v2201_v37 = vmax.f32 %v2417_v34, 0.2 }
 0x1ac   :  { %v2204_v38 = vmin.f32 %v2202_v36, 0.4 }
 0x1ad   :  { %v2203_v39 = vmin.f32 %v2201_v37, 0.4 }
 0x1ae   :  { %2207 = vst.msk [vmem:[%s3449_s3 + $0x8] sm:$0xff] %vm2205_vm0, %v2204_v38 }
 0x1af   :  { %2206 = vst.msk [vmem:[%s3449_s3] sm:$0xff] %vm2205_vm0, %v2203_v39 }

</bundles_post_ra>
